<compile_context>
chip_gen: v6e
topology: v6e:2x2x1
jax: 0.10.0
libtpu: 0.0.40
codegen_flags: <defaults>
</compile_context>

<pallas_src>
import functools
import math

import jax
import jax.numpy as jnp
import numpy as np
from jax.experimental import pallas as pl
from jax.experimental.pallas import tpu as pltpu

_LANE = 128
_SUBLANE = 8
_MAX_FUSED_ROWS = 8
_TARGET_FUSED_STEPS = 4          # >= 2 grid steps everywhere, ideally >= 4
_TARGET_PHASE_STEPS = 8
_MIN_FUSED_BLOCK_BYTES = 1 << 20  # keep fused blocks >= ~1 MiB


# ----------------------------------------------------------------------------
# Generation-aware VMEM / block budgets.
# ----------------------------------------------------------------------------
def _detect_vmem_capacity_bytes():
    try:
        cap = int(pltpu.get_tpu_info().vmem_capacity_bytes)
        if cap > 0:
            return cap
    except Exception:
        pass
    try:
        kind = jax.devices()[0].device_kind.lower()
        if "v7" in kind:
            return 64 * 1024 * 1024
    except Exception:
        pass
    return 128 * 1024 * 1024


@functools.lru_cache(maxsize=None)
def _hw_budgets():
    cap = _detect_vmem_capacity_bytes()
    if cap <= 80 * 1024 * 1024:
        # v7x-class: 64 MiB VMEM per TensorCore.  Double-buffered in+out of one
        # block is ~4x the block bytes; leave headroom for Mosaic scratch.
        return {"vmem_limit": 52 * 1024 * 1024, "block_bytes": 10 * 1024 * 1024}
    # v5e / v6e / other 128-MiB-VMEM chips: bigger blocks keep mid-size rows on
    # the fused path and tiles >= 512 lanes.
    return {"vmem_limit": 100 * 1024 * 1024, "block_bytes": 20 * 1024 * 1024}


# ----------------------------------------------------------------------------
# Gate math (shared): sigmoid(conv1d_k(mean)) from per-channel sums.
# ----------------------------------------------------------------------------
def _gate_from_sums_row(sums_row, w_ref, C, K, inv_hw):
    """sums_row: (1, C) f32 per-channel sums (channels on the lane axis).

    Zero-padded 1D cross-correlation over channels + sigmoid, matching PyTorch
    Conv1d(1, 1, K, padding=(K-1)//2, bias=False).  Returns (1, C) f32.
    """
    y = sums_row * inv_hw
    pad = (K - 1) // 2
    idx = jax.lax.broadcasted_iota(jnp.int32, (1, C), 1)
    conv = jnp.zeros((1, C), jnp.float32)
    for j in range(K):                                  # K is tiny & static
        off = j - pad
        shifted = pltpu.roll(y, (-off) % C, axis=1)     # shifted[c] = y[c+off]
        valid = (idx + off >= 0) & (idx + off < C)      # zero-pad boundary
        conv = conv + w_ref[j] * jnp.where(valid, shifted, 0.0)
    return jax.nn.sigmoid(conv)


# ----------------------------------------------------------------------------
# Fused path (small problems): one pass over x, several batch rows per block.
# ----------------------------------------------------------------------------
def _make_fused_kernel(n_blk, C, HW, K):
    inv_hw = 1.0 / float(HW)

    def kernel(w_ref, x_ref, o_ref):
        # x_ref block: (n_blk, C, HW).  Gate math is O(C) per row and hides
        # under the streaming DMA; the big tile is only touched in the input
        # dtype.  NOTE: when N % n_blk != 0 the padded rows of the last block
        # hold undefined data; they flow through sum/sigmoid (possibly inf/nan)
        # but their stores fall outside the array and are dropped -- benign.
        for i in range(n_blk):
            xi = x_ref[i]                                              # (C, HW)
            sums = jnp.sum(xi, axis=1, dtype=jnp.float32).reshape(1, C)
            gate = _gate_from_sums_row(sums, w_ref, C, K, inv_hw)      # (1,C) f32
            o_ref[i] = xi * gate.reshape(C, 1).astype(o_ref.dtype)

    return kernel


def _eca_fused(x3, w, n_blk, K, vmem_limit):
    N, C, HW = x3.shape
    return pl.pallas_call(
        _make_fused_kernel(n_blk, C, HW, K),
        out_shape=jax.ShapeDtypeStruct((N, C, HW), x3.dtype),
        grid=(pl.cdiv(N, n_blk),),
        in_specs=[
            pl.BlockSpec(memory_space=pltpu.MemorySpace.SMEM),          # taps
            pl.BlockSpec((n_blk, C, HW), lambda i: (i, 0, 0)),
        ],
        out_specs=pl.BlockSpec((n_blk, C, HW), lambda i: (i, 0, 0)),
        compiler_params=pltpu.CompilerParams(
            dimension_semantics=("parallel",),
            vmem_limit_bytes=vmem_limit),
    )(w, x3)


# ----------------------------------------------------------------------------
# Two-phase path (large C*HW): partial sums -> gate finalize -> lane-dense scale
# ----------------------------------------------------------------------------
def _make_partial_sum_kernel(C, HW, hw_blk):
    has_tail = (HW % hw_blk) != 0

    def kernel(x_ref, p_ref):
        xb = x_ref[0]                                                  # (C, hw_blk)
        if has_tail:                                                   # mask padded lanes
            t = pl.program_id(1)
            col = jax.lax.broadcasted_iota(jnp.int32, (C, hw_blk), 1) + t * hw_blk
            xb = jnp.where(col < HW, xb, jnp.zeros_like(xb))
        p_ref[0, 0] = jnp.sum(xb, axis=1, dtype=jnp.float32).reshape(1, C)

    return kernel


def _make_gate_finalize_kernel(C, HW, K):
    inv_hw = 1.0 / float(HW)

    def kernel(w_ref, p_ref, g_ref):
        sums = jnp.sum(p_ref[...], axis=(0, 1, 2)).reshape(1, C)       # (1,C) f32
        gate = _gate_from_sums_row(sums, w_ref, C, K, inv_hw)
        # Cast once here: the scale kernel then multiplies same-dtype operands
        # and the gate DMA is in the (possibly 16-bit) activation dtype.
        g_ref[0] = gate.reshape(C, 1).astype(g_ref.dtype)

    return kernel


def _scale_kernel(x_ref, g_ref, o_ref):
    # x_ref: (1, c_blk, hw_blk) activation dtype; g_ref: (1, c_blk, 1) same dtype.
    o_ref[0] = x_ref[0] * g_ref[0]


def _shrink_for_steps(hw_blk, steps_fn):
    """Halve the (128-aligned) spatial tile until the grid has enough steps."""
    while steps_fn(hw_blk) < _TARGET_PHASE_STEPS:
        nxt = (hw_blk // 2) // _LANE * _LANE
        if nxt < 4 * _LANE:          # keep tiles >= 512 lanes (HBM roofline)
            break
        hw_blk = nxt
    return hw_blk


def _pick_two_phase_tiles(N, C, HW, itemsize, budget):
    # Channel tile (phase 2): prefer full C; tile in multiples of 8 only when a
    # single 128-lane column of all channels would blow the block budget.
    if C <= _SUBLANE or C * _LANE * itemsize <= budget:
        c_blk = C
    else:
        c_blk = min(C, max(_SUBLANE,
                           (budget // (_LANE * itemsize)) // _SUBLANE * _SUBLANE))

    # Spatial tile (phase 2): lane-dense (multiple of 128), as large as budget
    # allows, then shrunk until the grid can pipeline / feed both v7x cores.
    cap2 = max(_LANE, budget // max(1, c_blk * itemsize))
    hw_blk = HW if HW <= cap2 else max(_LANE, (min(cap2, HW) // _LANE) * _LANE)
    hw_blk = _shrink_for_steps(
        hw_blk, lambda h: N * pl.cdiv(C, c_blk) * pl.cdiv(HW, h))

    # Spatial tile (phase 1): full C (the channel conv needs every channel; ECA
    # channel counts keep C*128*itemsize comfortably inside VMEM).
    cap1 = max(_LANE, budget // max(1, C * itemsize))
    hw1_blk = HW if HW <= cap1 else max(_LANE, (min(cap1, HW) // _LANE) * _LANE)
    hw1_blk = _shrink_for_steps(hw1_blk, lambda h: N * pl.cdiv(HW, h))
    return c_blk, hw_blk, hw1_blk


def _eca_two_phase(x3, w, K, budget, vmem_limit):
    N, C, HW = x3.shape
    itemsize = x3.dtype.itemsize
    c_blk, hw_blk, hw1_blk = _pick_two_phase_tiles(N, C, HW, itemsize, budget)
    n_c = pl.cdiv(C, c_blk)
    n_hw = pl.cdiv(HW, hw_blk)
    n_hw1 = pl.cdiv(HW, hw1_blk)

    # Phase 1a: per-(image, hw-tile) partial channel sums.  Both grid axes are
    # "parallel" so the streaming read of x is split across TensorCores even
    # when N == 1 (v7x); the tiny partial-sum output is negligible traffic.
    partial = pl.pallas_call(
        _make_partial_sum_kernel(C, HW, hw1_blk),
        out_shape=jax.ShapeDtypeStruct((N, n_hw1, 1, C), jnp.float32),
        grid=(N, n_hw1),
        in_specs=[pl.BlockSpec((1, C, hw1_blk), lambda n, t: (n, 0, t))],
        out_specs=pl.BlockSpec((1, 1, 1, C), lambda n, t: (n, t, 0, 0)),
        compiler_params=pltpu.CompilerParams(
            dimension_semantics=("parallel", "parallel"),
            vmem_limit_bytes=vmem_limit),
    )(x3)

    # Phase 1b: reduce partials, conv1d over channels + sigmoid (f32), emit the
    # gate already cast to the activation dtype.  O(N * C) work.
    gate = pl.pallas_call(
        _make_gate_finalize_kernel(C, HW, K),
        out_shape=jax.ShapeDtypeStruct((N, C, 1), x3.dtype),
        grid=(N,),
        in_specs=[
            pl.BlockSpec(memory_space=pltpu.MemorySpace.SMEM),
            pl.BlockSpec((1, n_hw1, 1, C), lambda n: (n, 0, 0, 0)),
        ],
        out_specs=pl.BlockSpec((1, C, 1), lambda n: (n, 0, 0)),
        compiler_params=pltpu.CompilerParams(
            dimension_semantics=("parallel",),
            vmem_limit_bytes=vmem_limit),
    )(w, partial)

    # Phase 2: lane-dense scale, fully parallel grid (N, C-tiles, HW-tiles).
    return pl.pallas_call(
        _scale_kernel,
        out_shape=jax.ShapeDtypeStruct((N, C, HW), x3.dtype),
        grid=(N, n_c, n_hw),
        in_specs=[
            pl.BlockSpec((1, c_blk, hw_blk), lambda n, c, t: (n, c, t)),
            pl.BlockSpec((1, c_blk, 1), lambda n, c, t: (n, c, 0)),
        ],
        out_specs=pl.BlockSpec((1, c_blk, hw_blk), lambda n, c, t: (n, c, t)),
        compiler_params=pltpu.CompilerParams(
            dimension_semantics=("parallel", "parallel", "parallel"),
            vmem_limit_bytes=vmem_limit),
    )(x3, gate)


# ----------------------------------------------------------------------------
# Public forward.
# ----------------------------------------------------------------------------
def eca_forward(x, w, *, block_bytes_budget=None, vmem_limit_bytes=None,
                force_two_phase=False):
    """ECA forward.  x: (N, C, H, W); w: (K,) Conv1d taps (out=1, in=1, no bias)."""
    N, C, H, W = map(int, x.shape)
    HW = H * W
    K = int(w.shape[0])

    budgets = _hw_budgets()
    budget = int(block_bytes_budget) if block_bytes_budget else budgets["block_bytes"]
    vmem_limit = int(vmem_limit_bytes) if vmem_limit_bytes else budgets["vmem_limit"]

    x3 = x.reshape(N, C, HW)
    per_row = C * HW * x3.dtype.itemsize

    if (not force_two_phase) and per_row <= budget:
        # Fused single pass (2x HBM traffic).  Cap rows/block so the grid has
        # >= _TARGET_FUSED_STEPS steps (pipelining + both v7x TensorCores)
        # while keeping each block >= ~1 MiB so per-step overhead is amortized.
        rows_budget = max(1, budget // per_row)
        rows_steps = max(1, -(-N // _TARGET_FUSED_STEPS))       # ceil(N / steps)
        rows_1mib = max(1, -(-_MIN_FUSED_BLOCK_BYTES // per_row))
        n_blk = min(N, _MAX_FUSED_ROWS, rows_budget, max(rows_steps, rows_1mib))
        out = _eca_fused(x3, w, n_blk, K, vmem_limit)
    else:
        out = _eca_two_phase(x3, w, K, budget, vmem_limit)
    return out.reshape(N, C, H, W)


def eca_reference(x, w):
    """Pure-JAX reference mirroring the PyTorch forward."""
    N, C, H, W = x.shape
    K = int(w.shape[0])
    pad = (K - 1) // 2
    y = jnp.mean(x.astype(jnp.float32), axis=(2, 3))             # (N, C)
    yp = jnp.pad(y, ((0, 0), (pad, pad)))
    conv = sum(w[j] * yp[:, j:j + C] for j in range(K))          # cross-correlation
    gate = jax.nn.sigmoid(conv)[:, :, None, None]                # (N, C, 1, 1)
    return (x * gate.astype(x.dtype)).astype(x.dtype)


if __name__ == "__main__":
    def k_size_for(C, gamma=2, b=1):
        t = int(abs(math.log(float(C), 2.0) + b) / gamma)
        return t if t % 2 else t + 1

    def run_case(x, w, **kw):
        ref = eca_reference(x, w)
        out = eca_forward(x, w, **kw)
        jax.block_until_ready(out)
        np.testing.assert_allclose(np.asarray(out), np.asarray(ref),
                                   rtol=1e-5, atol=1e-5)

    key = jax.random.PRNGKey(0)

    # Case 1: small problem -> fused single-pass path (ECAModule: C=16 -> k=3).
    N, C, H, W = 2, 16, 16, 16
    k = k_size_for(C)
    kw1, kx1, key = jax.random.split(key, 3)
    bound = 1.0 / math.sqrt(k)
    w1 = jax.random.uniform(kw1, (k,), jnp.float32, -bound, bound)
    x1 = jax.random.normal(kx1, (N, C, H, W), jnp.float32)
    run_case(x1, w1)

    # Case 2: same tensor through the two-phase path (partial-sum gate + gate
    # finalize + lane-dense scale); tiny budget forces HW tiling (128-lane tiles).
    run_case(x1, w1, force_two_phase=True, block_bytes_budget=8 * 1024)

    # Case 3: two-phase path with channel tiling (C % c_blk edge), non-128-
    # multiple HW (tail-lane masking in phase 1, dropped OOB stores in phase 2).
    N3, C3, H3, W3 = 2, 24, 20, 20
    k3 = k_size_for(C3)
    kw3, kx3, key = jax.random.split(key, 3)
    b3 = 1.0 / math.sqrt(k3)
    w3 = jax.random.uniform(kw3, (k3,), jnp.float32, -b3, b3)
    x3_ = jax.random.normal(kx3, (N3, C3, H3, W3), jnp.float32)
    run_case(x3_, w3, force_two_phase=True, block_bytes_budget=8 * 1024)

    # Case 4: fused path with N % n_blk != 0 (padded last batch block).
    N4, C4, H4, W4 = 3, 8, 16, 16
    k4 = k_size_for(C4)
    kw4, kx4, key = jax.random.split(key, 3)
    b4 = 1.0 / math.sqrt(k4)
    w4 = jax.random.uniform(kw4, (k4,), jnp.float32, -b4, b4)
    x4 = jax.random.normal(kx4, (N4, C4, H4, W4), jnp.float32)
    run_case(x4, w4, block_bytes_budget=16 * 1024)

    print("KERNEL_OK")
</pallas_src>

<mosaic_0001>
module attributes {stable_mosaic.version = 11 : i64} {
  func.func @kernel(%arg0: i32, %arg1: memref<3xf32, #tpu.memory_space<smem>>, %arg2: memref<2x16x256xf32, #tpu.memory_space<vmem>>, %arg3: memref<2x16x256xf32, #tpu.memory_space<vmem>>) attributes {dimension_semantics = [#tpu.dimension_semantics<parallel>], iteration_bounds = array<i64: 1>, scalar_prefetch = 0 : i64, scratch_operands = 0 : i64, tpu.core_type = #tpu.core_type<tc>, window_params = [{transform_indices = @transform_0, window_bounds = array<i64: 3>}, {transform_indices = @transform_1, window_bounds = array<i64: 2, 16, 256>}, {transform_indices = @transform_2, window_bounds = array<i64: 2, 16, 256>}]} {
    %c0 = arith.constant 0 : index
    %c0_0 = arith.constant 0 : index
    %c0_1 = arith.constant 0 : index
    %0 = vector.load %arg2[%c0, %c0_0, %c0_1] : memref<2x16x256xf32, #tpu.memory_space<vmem>>, vector<1x16x256xf32>
    %1 = vector.shape_cast %0 : vector<1x16x256xf32> to vector<16x256xf32>
    %cst = arith.constant dense<0.000000e+00> : vector<16xf32>
    %2 = vector.multi_reduction <add>, %1, %cst [1] : vector<16x256xf32> to vector<16xf32>
    %3 = vector.shape_cast %2 : vector<16xf32> to vector<1x16xf32>
    %cst_2 = arith.constant 3.906250e-03 : f32
    %4 = vector.broadcast %cst_2 : f32 to vector<1x16xf32>
    %5 = arith.mulf %3, %4 : vector<1x16xf32>
    %6 = tpu.iota {dimensions = array<i32: 1>} : vector<1x16xi32>
    %cst_3 = arith.constant 0.000000e+00 : f32
    %7 = vector.broadcast %cst_3 : f32 to vector<1x16xf32>
    %c1_i32 = arith.constant 1 : i32
    %8 = tpu.dynamic_rotate %5 by %c1_i32 dim 1 : vector<1x16xf32>, i32 -> vector<1x16xf32>
    %c-1_i32 = arith.constant -1 : i32
    %9 = vector.broadcast %c-1_i32 : i32 to vector<1x16xi32>
    %10 = arith.addi %6, %9 : vector<1x16xi32>
    %c0_i32 = arith.constant 0 : i32
    %11 = vector.broadcast %c0_i32 : i32 to vector<1x16xi32>
    %12 = arith.cmpi sge, %10, %11 : vector<1x16xi32>
    %c-1_i32_4 = arith.constant -1 : i32
    %13 = vector.broadcast %c-1_i32_4 : i32 to vector<1x16xi32>
    %14 = arith.addi %6, %13 : vector<1x16xi32>
    %c16_i32 = arith.constant 16 : i32
    %15 = vector.broadcast %c16_i32 : i32 to vector<1x16xi32>
    %16 = arith.cmpi slt, %14, %15 : vector<1x16xi32>
    %17 = arith.andi %12, %16 : vector<1x16xi1>
    %c0_5 = arith.constant 0 : index
    %18 = memref.load %arg1[%c0_5] : memref<3xf32, #tpu.memory_space<smem>>
    %cst_6 = arith.constant 0.000000e+00 : f32
    %19 = vector.broadcast %cst_6 : f32 to vector<1x16xf32>
    %20 = arith.select %17, %8, %19 : vector<1x16xi1>, vector<1x16xf32>
    %21 = vector.broadcast %18 : f32 to vector<1x16xf32>
    %22 = arith.mulf %21, %20 : vector<1x16xf32>
    %23 = arith.addf %7, %22 : vector<1x16xf32>
    %c0_i32_7 = arith.constant 0 : i32
    %24 = tpu.dynamic_rotate %5 by %c0_i32_7 dim 1 : vector<1x16xf32>, i32 -> vector<1x16xf32>
    %c0_i32_8 = arith.constant 0 : i32
    %25 = vector.broadcast %c0_i32_8 : i32 to vector<1x16xi32>
    %26 = arith.addi %6, %25 : vector<1x16xi32>
    %c0_i32_9 = arith.constant 0 : i32
    %27 = vector.broadcast %c0_i32_9 : i32 to vector<1x16xi32>
    %28 = arith.cmpi sge, %26, %27 : vector<1x16xi32>
    %c0_i32_10 = arith.constant 0 : i32
    %29 = vector.broadcast %c0_i32_10 : i32 to vector<1x16xi32>
    %30 = arith.addi %6, %29 : vector<1x16xi32>
    %c16_i32_11 = arith.constant 16 : i32
    %31 = vector.broadcast %c16_i32_11 : i32 to vector<1x16xi32>
    %32 = arith.cmpi slt, %30, %31 : vector<1x16xi32>
    %33 = arith.andi %28, %32 : vector<1x16xi1>
    %c1 = arith.constant 1 : index
    %34 = memref.load %arg1[%c1] : memref<3xf32, #tpu.memory_space<smem>>
    %cst_12 = arith.constant 0.000000e+00 : f32
    %35 = vector.broadcast %cst_12 : f32 to vector<1x16xf32>
    %36 = arith.select %33, %24, %35 : vector<1x16xi1>, vector<1x16xf32>
    %37 = vector.broadcast %34 : f32 to vector<1x16xf32>
    %38 = arith.mulf %37, %36 : vector<1x16xf32>
    %39 = arith.addf %23, %38 : vector<1x16xf32>
    %c15_i32 = arith.constant 15 : i32
    %40 = tpu.dynamic_rotate %5 by %c15_i32 dim 1 : vector<1x16xf32>, i32 -> vector<1x16xf32>
    %c1_i32_13 = arith.constant 1 : i32
    %41 = vector.broadcast %c1_i32_13 : i32 to vector<1x16xi32>
    %42 = arith.addi %6, %41 : vector<1x16xi32>
    %c0_i32_14 = arith.constant 0 : i32
    %43 = vector.broadcast %c0_i32_14 : i32 to vector<1x16xi32>
    %44 = arith.cmpi sge, %42, %43 : vector<1x16xi32>
    %c1_i32_15 = arith.constant 1 : i32
    %45 = vector.broadcast %c1_i32_15 : i32 to vector<1x16xi32>
    %46 = arith.addi %6, %45 : vector<1x16xi32>
    %c16_i32_16 = arith.constant 16 : i32
    %47 = vector.broadcast %c16_i32_16 : i32 to vector<1x16xi32>
    %48 = arith.cmpi slt, %46, %47 : vector<1x16xi32>
    %49 = arith.andi %44, %48 : vector<1x16xi1>
    %c2 = arith.constant 2 : index
    %50 = memref.load %arg1[%c2] : memref<3xf32, #tpu.memory_space<smem>>
    %cst_17 = arith.constant 0.000000e+00 : f32
    %51 = vector.broadcast %cst_17 : f32 to vector<1x16xf32>
    %52 = arith.select %49, %40, %51 : vector<1x16xi1>, vector<1x16xf32>
    %53 = vector.broadcast %50 : f32 to vector<1x16xf32>
    %54 = arith.mulf %53, %52 : vector<1x16xf32>
    %55 = arith.addf %39, %54 : vector<1x16xf32>
    %56 = arith.negf %55 : vector<1x16xf32>
    %57 = math.exp %56 : vector<1x16xf32>
    %cst_18 = arith.constant 1.000000e+00 : f32
    %58 = vector.broadcast %cst_18 : f32 to vector<1x16xf32>
    %59 = arith.addf %58, %57 : vector<1x16xf32>
    %60 = arith.divf %58, %59 : vector<1x16xf32>
    %61 = vector.shape_cast %60 : vector<1x16xf32> to vector<16x1xf32>
    %62 = vector.broadcast %61 : vector<16x1xf32> to vector<16x256xf32>
    %63 = arith.mulf %1, %62 : vector<16x256xf32>
    %c0_19 = arith.constant 0 : index
    %c0_20 = arith.constant 0 : index
    %c0_21 = arith.constant 0 : index
    %64 = vector.load %arg3[%c0_19, %c0_20, %c0_21] : memref<2x16x256xf32, #tpu.memory_space<vmem>>, vector<1x16x256xf32>
    %65 = vector.shape_cast %64 : vector<1x16x256xf32> to vector<16x256xf32>
    %66 = vector.shape_cast %63 : vector<16x256xf32> to vector<1x16x256xf32>
    tpu.vector_store %arg3[%c0_19, %c0_20, %c0_21], %66 {strides = array<i32>} : memref<2x16x256xf32, #tpu.memory_space<vmem>>, vector<1x16x256xf32>,
    %c1_22 = arith.constant 1 : index
    %c0_23 = arith.constant 0 : index
    %c0_24 = arith.constant 0 : index
    %67 = vector.load %arg2[%c1_22, %c0_23, %c0_24] : memref<2x16x256xf32, #tpu.memory_space<vmem>>, vector<1x16x256xf32>
    %68 = vector.shape_cast %67 : vector<1x16x256xf32> to vector<16x256xf32>
    %cst_25 = arith.constant dense<0.000000e+00> : vector<16xf32>
    %69 = vector.multi_reduction <add>, %68, %cst_25 [1] : vector<16x256xf32> to vector<16xf32>
    %70 = vector.shape_cast %69 : vector<16xf32> to vector<1x16xf32>
    %cst_26 = arith.constant 3.906250e-03 : f32
    %71 = vector.broadcast %cst_26 : f32 to vector<1x16xf32>
    %72 = arith.mulf %70, %71 : vector<1x16xf32>
    %73 = tpu.iota {dimensions = array<i32: 1>} : vector<1x16xi32>
    %cst_27 = arith.constant 0.000000e+00 : f32
    %74 = vector.broadcast %cst_27 : f32 to vector<1x16xf32>
    %c1_i32_28 = arith.constant 1 : i32
    %75 = tpu.dynamic_rotate %72 by %c1_i32_28 dim 1 : vector<1x16xf32>, i32 -> vector<1x16xf32>
    %c-1_i32_29 = arith.constant -1 : i32
    %76 = vector.broadcast %c-1_i32_29 : i32 to vector<1x16xi32>
    %77 = arith.addi %73, %76 : vector<1x16xi32>
    %c0_i32_30 = arith.constant 0 : i32
    %78 = vector.broadcast %c0_i32_30 : i32 to vector<1x16xi32>
    %79 = arith.cmpi sge, %77, %78 : vector<1x16xi32>
    %c-1_i32_31 = arith.constant -1 : i32
    %80 = vector.broadcast %c-1_i32_31 : i32 to vector<1x16xi32>
    %81 = arith.addi %73, %80 : vector<1x16xi32>
    %c16_i32_32 = arith.constant 16 : i32
    %82 = vector.broadcast %c16_i32_32 : i32 to vector<1x16xi32>
    %83 = arith.cmpi slt, %81, %82 : vector<1x16xi32>
    %84 = arith.andi %79, %83 : vector<1x16xi1>
    %c0_33 = arith.constant 0 : index
    %85 = memref.load %arg1[%c0_33] : memref<3xf32, #tpu.memory_space<smem>>
    %cst_34 = arith.constant 0.000000e+00 : f32
    %86 = vector.broadcast %cst_34 : f32 to vector<1x16xf32>
    %87 = arith.select %84, %75, %86 : vector<1x16xi1>, vector<1x16xf32>
    %88 = vector.broadcast %85 : f32 to vector<1x16xf32>
    %89 = arith.mulf %88, %87 : vector<1x16xf32>
    %90 = arith.addf %74, %89 : vector<1x16xf32>
    %c0_i32_35 = arith.constant 0 : i32
    %91 = tpu.dynamic_rotate %72 by %c0_i32_35 dim 1 : vector<1x16xf32>, i32 -> vector<1x16xf32>
    %c0_i32_36 = arith.constant 0 : i32
    %92 = vector.broadcast %c0_i32_36 : i32 to vector<1x16xi32>
    %93 = arith.addi %73, %92 : vector<1x16xi32>
    %c0_i32_37 = arith.constant 0 : i32
    %94 = vector.broadcast %c0_i32_37 : i32 to vector<1x16xi32>
    %95 = arith.cmpi sge, %93, %94 : vector<1x16xi32>
    %c0_i32_38 = arith.constant 0 : i32
    %96 = vector.broadcast %c0_i32_38 : i32 to vector<1x16xi32>
    %97 = arith.addi %73, %96 : vector<1x16xi32>
    %c16_i32_39 = arith.constant 16 : i32
    %98 = vector.broadcast %c16_i32_39 : i32 to vector<1x16xi32>
    %99 = arith.cmpi slt, %97, %98 : vector<1x16xi32>
    %100 = arith.andi %95, %99 : vector<1x16xi1>
    %c1_40 = arith.constant 1 : index
    %101 = memref.load %arg1[%c1_40] : memref<3xf32, #tpu.memory_space<smem>>
    %cst_41 = arith.constant 0.000000e+00 : f32
    %102 = vector.broadcast %cst_41 : f32 to vector<1x16xf32>
    %103 = arith.select %100, %91, %102 : vector<1x16xi1>, vector<1x16xf32>
    %104 = vector.broadcast %101 : f32 to vector<1x16xf32>
    %105 = arith.mulf %104, %103 : vector<1x16xf32>
    %106 = arith.addf %90, %105 : vector<1x16xf32>
    %c15_i32_42 = arith.constant 15 : i32
    %107 = tpu.dynamic_rotate %72 by %c15_i32_42 dim 1 : vector<1x16xf32>, i32 -> vector<1x16xf32>
    %c1_i32_43 = arith.constant 1 : i32
    %108 = vector.broadcast %c1_i32_43 : i32 to vector<1x16xi32>
    %109 = arith.addi %73, %108 : vector<1x16xi32>
    %c0_i32_44 = arith.constant 0 : i32
    %110 = vector.broadcast %c0_i32_44 : i32 to vector<1x16xi32>
    %111 = arith.cmpi sge, %109, %110 : vector<1x16xi32>
    %c1_i32_45 = arith.constant 1 : i32
    %112 = vector.broadcast %c1_i32_45 : i32 to vector<1x16xi32>
    %113 = arith.addi %73, %112 : vector<1x16xi32>
    %c16_i32_46 = arith.constant 16 : i32
    %114 = vector.broadcast %c16_i32_46 : i32 to vector<1x16xi32>
    %115 = arith.cmpi slt, %113, %114 : vector<1x16xi32>
    %116 = arith.andi %111, %115 : vector<1x16xi1>
    %c2_47 = arith.constant 2 : index
    %117 = memref.load %arg1[%c2_47] : memref<3xf32, #tpu.memory_space<smem>>
    %cst_48 = arith.constant 0.000000e+00 : f32
    %118 = vector.broadcast %cst_48 : f32 to vector<1x16xf32>
    %119 = arith.select %116, %107, %118 : vector<1x16xi1>, vector<1x16xf32>
    %120 = vector.broadcast %117 : f32 to vector<1x16xf32>
    %121 = arith.mulf %120, %119 : vector<1x16xf32>
    %122 = arith.addf %106, %121 : vector<1x16xf32>
    %123 = arith.negf %122 : vector<1x16xf32>
    %124 = math.exp %123 : vector<1x16xf32>
    %cst_49 = arith.constant 1.000000e+00 : f32
    %125 = vector.broadcast %cst_49 : f32 to vector<1x16xf32>
    %126 = arith.addf %125, %124 : vector<1x16xf32>
    %127 = arith.divf %125, %126 : vector<1x16xf32>
    %128 = vector.shape_cast %127 : vector<1x16xf32> to vector<16x1xf32>
    %129 = vector.broadcast %128 : vector<16x1xf32> to vector<16x256xf32>
    %130 = arith.mulf %68, %129 : vector<16x256xf32>
    %c1_50 = arith.constant 1 : index
    %c0_51 = arith.constant 0 : index
    %c0_52 = arith.constant 0 : index
    %131 = vector.load %arg3[%c1_50, %c0_51, %c0_52] : memref<2x16x256xf32, #tpu.memory_space<vmem>>, vector<1x16x256xf32>
    %132 = vector.shape_cast %131 : vector<1x16x256xf32> to vector<16x256xf32>
    %133 = vector.shape_cast %130 : vector<16x256xf32> to vector<1x16x256xf32>
    tpu.vector_store %arg3[%c1_50, %c0_51, %c0_52], %133 {strides = array<i32>} : memref<2x16x256xf32, #tpu.memory_space<vmem>>, vector<1x16x256xf32>,
    return
  }
  func.func @transform_0(%arg0: i32) -> i32 {
    %c0_i32 = arith.constant 0 : i32
    %c0_i32_0 = arith.constant 0 : i32
    return %c0_i32 : i32
  }
  func.func @transform_1(%arg0: i32) -> (i32, i32, i32) {
    %c0_i32 = arith.constant 0 : i32
    %c0_i32_0 = arith.constant 0 : i32
    %c0_i32_1 = arith.constant 0 : i32
    return %arg0, %c0_i32, %c0_i32_0 : i32, i32, i32
  }
  func.func @transform_2(%arg0: i32) -> (i32, i32, i32) {
    %c0_i32 = arith.constant 0 : i32
    %c0_i32_0 = arith.constant 0 : i32
    %c0_i32_1 = arith.constant 0 : i32
    return %arg0, %c0_i32, %c0_i32_0 : i32, i32, i32
  }
}

</mosaic_0001>

<bundles_post_ra>
// kernel: tpu_custom_call.1
= control target key start
LH: loop header
LB: loop body
LE: loop exit
PB: predicated region body
PF: predicated region fallthrough
CT: control target
= control target key end

     0   :  { %7 = vsyncpa [#allocation5], 0  ;;  %s396_s0 = inlined_call_operand.hbm [shape: f32[3], index: 0, kind: input, shape index: {}]   ;;  %s397_s1 = inlined_call_operand.hbm [shape: f32[2,16,256], index: 1, kind: input, shape index: {}]   ;;  %s398_s2 = inlined_call_operand.hbm [shape: f32[2,16,256], index: 2, kind: output, shape index: {}]  }
   0x1   :  { %8 = vsyncpa [#allocation3], 0 }
   0x2   :  { %9 = vsyncpa [#allocation4], 0  ;;  %s309_s9 = smov [#allocation2]   ;;  %s310_s12 = smov [#allocation6]  }
   0x3   :  { %17 = dma.hbm_to_smem %s396_s0, 16, %s309_s9, [#allocation5]  }
   0x4   :  { %s23_s13 = sshll.u32 %s310_s12, 4  ;;  %s24_s13 = int_to_ptr.vmem [resolvable:$true] %s23_s13 }
   0x5   :  { %s271_s14 = scalar_lea.vmem %s24_s13, 1024  ;;  %p276_p1 = scmp.lt.s32.totalorder %s24_s13, %s24_s13 }
   0x6   :  { %p272_p0 = scmp.ne.s32.totalorder %s24_s13, %s271_s14  ;;  %p277_p2 = scmp.lt.s32.totalorder %s271_s14, %s271_s14 }
   0x8   :  { %p278_p3 = por %p277_p2, %p276_p1 }
   0xa   :  { %p279_p4 = pnand %p278_p3, %p272_p0 }
   0xc   :  { %282 = shalt.err (!%p279_p4)
}
   0xd   :  { %s311_s15 = smov 256   ;;  %s312_s16 = smov 16  }
   0xe   :  { %29 = dma.hbm_to_vmem [thread:$0]  %s397_s1, 1024, %s24_s13, [#allocation3], %s311_s15, %s311_s15, %s312_s16  }
   0xf   :  { %303 = dma.done.wait [#allocation5], 16  }
  0x10   :  { %304 = vsyncadd [#allocation5], 4294967280 }
  0x11   :  { %305 = dma.done.wait [#allocation3], 1024  }
  0x12   :  { %306 = vsyncadd [#allocation3], 4294966272 }
  0x13   :  { %36 = sfence }
  0x14   :  { %v341_v0 = vld [vmem:[#allocation6 + $0x20] sm:$0xff]  ;;  %v343_v1 = vld [vmem:[#allocation6 + $0x28] sm:$0xff]  ;;  %v351_v5 = vld [vmem:[#allocation6 + $0x30] sm:$0xff]  ;;  %v49_v12 = vlaneseq  ;;  %vm62_vm0 = vcmask 130112   ;;  %vm65_vm1 = vcmask 1047680   ;;  %s313_s0 = smov 112  }
  0x15   :  { %v345_v2 = vld [vmem:[#allocation6] sm:$0xff]  ;;  %v138_v3 = vadd.f32 %v343_v1, %v341_v0  ;;  %v349_v4 = vld [vmem:[#allocation6 + $0x8] sm:$0xff]  ;;  %v353_v6 = vld [vmem:[#allocation6 + $0x38] sm:$0xff]  ;;  %s314_s1 = smov 113   ;;  %s315_s19 = smov 127  }
  0x16   :  { %v41_v7 = vadd.f32 %v349_v4, %v345_v2  ;;  %v357_v8 = vld [vmem:[#allocation6 + $0x10] sm:$0xff]  ;;  %v359_v9 = vld [vmem:[#allocation6 + $0x18] sm:$0xff]  ;;  %v141_v10 = vadd.f32 %v353_v6, %v351_v5  ;;  %v50_v13 = vand.u32 127, %v49_v12  ;;  %v365_v14 = vshrl.u32 %v49_v12, 7  ;;  %s76_s20 = sld [smem:[#allocation2]]  ;;  %s316_s23 = smov [#allocation7]  }
  0x17   :  { %139 = vadd.xlane.f32.xlu1 %v138_v3  ;;  %v44_v11 = vadd.f32 %v359_v9, %v357_v8  ;;  %s233_s21 = sld [smem:[#allocation2 + $0x1]]  ;;  %s220_s24 = sshll.u32 %s316_s23, 4  ;;  %s221_s24 = int_to_ptr.vmem [resolvable:$true] %s220_s24 }
  0x18   :  { %42 = vadd.xlane.f32.xlu0 %v41_v7  ;;  %v57_v15 = vadd.s32 4294967288, %v50_v13  ;;  %v55_v19 = vsub.s32 %v50_v13, %v365_v14  ;;  %v72_v40 = vadd.s32 4294967295, %v50_v13  ;;  %s234_s22 = sld [smem:[#allocation2 + $0x2]]  ;;  %vm86_vm5 = vcmp.lt.s32.totalorder %v50_v13, 16  ;;  %s283_s25 = scalar_lea.vmem %s221_s24, 1024 }
  0x19   :  { %v96_v44 = vadd.s32 1, %v50_v13  ;;  %p284_p5 = scmp.ne.s32.totalorder %s221_s24, %s283_s25  ;;  %p288_p6 = scmp.lt.s32.totalorder %s221_s24, %s221_s24 }
  0x1a   :  { %v60_v20 = vsub.s32 %v57_v15, %v365_v14  ;;  %vm73_vm2 = vcmp.ge.s32.totalorder %v72_v40, 0  ;;  %vm74_vm3 = vcmp.lt.s32.totalorder %v72_v40, 16  ;;  %p289_p7 = scmp.lt.s32.totalorder %s283_s25, %s283_s25 }
  0x1b   :  { %142 = vadd.xlane.f32.xlu1 %v141_v10  ;;  %vm373_vm4 = vmand %vm73_vm2, %vm74_vm3  ;;  %vm98_vm6 = vcmp.lt.s32.totalorder %v96_v44, 16 }
  0x1c   :  { %45 = vadd.xlane.f32.xlu0 %v44_v11  ;;  %v82_v45 = vstv %s76_s20  ;;  %p290_p8 = por %p289_p7, %p288_p6 }
  0x1d   :  { %v93_v47 = vstv %s233_s21 }
  0x1e   :  { %v105_v57 = vstv %s234_s22  ;;  %p291_p9 = pnand %p290_p8, %p284_p5 }
  0xa0   :  { %v140_v16 = vpop.xlane.xlu1 %139 }
  0xa1   :  { %v144_v17 = vmul.f32 0.00390625, %v140_v16  ;;  %v43_v18 = vpop.xlane.xlu0 %42 }
  0xa2   :  { %v47_v21 = vmul.f32 0.00390625, %v43_v18 }
  0xa3   :  { %v151_v23 = vrot.slane %v144_v17, %v55_v19 }
  0xa4   :  { %v143_v22 = vpop.xlane.xlu1 %142  ;;  %v56_v28 = vrot.slane %v47_v21, %v55_v19  ;;  %v116_v19 = vsub.s32 0, %v365_v14 }
  0xa5   :  { %v145_v24 = vmul.f32 0.00390625, %v143_v22  ;;  %v46_v25 = vpop.xlane.xlu0 %45 }
  0xa6   :  { %v48_v26 = vmul.f32 0.00390625, %v46_v25 }
  0xa7   :  { %v155_v27 = vrot.slane %v145_v24, %v60_v20 }
  0xa8   :  { %v61_v29 = vrot.slane %v48_v26, %v60_v20 }
  0xa9   :  { %v156_v30 = vsel %vm62_vm0, %v155_v27, %v151_v23 }
  0xaa   :  { %158 = vrot.lane.b32.xlu1 %v156_v30, %s312_s16  ;;  %v63_v31 = vsel %vm62_vm0, %v61_v29, %v56_v28 }
  0xab   :  { %66 = vrot.lane.b32.xlu0 %v63_v31, %s312_s16 }
 0x11c   :  { %v159_v34 = vpop.permute.xlu1 %158 }
 0x11d   :  { %v67_v32 = vpop.permute.xlu0 %66  ;;  %v160_v35 = vsel %vm65_vm1, %v159_v34, %v156_v30 }
 0x11e   :  { %v68_v33 = vsel %vm65_vm1, %v67_v32, %v63_v31 }
 0x11f   :  { %69 = vrot.lane.b32.xlu1 %v68_v33, %s312_s16 }
 0x123   :  { %161 = vrot.lane.b32.xlu1 %v160_v35, %s312_s16 }
 0x191   :  { %v70_v36 = vpop.permute.xlu1 %69 }
 0x192   :  { %v71_v37 = vsel %vm65_vm1, %v70_v36, %v63_v31 }
 0x193   :  { %89 = vrot.lane.b32.xlu1 %v71_v37, %s313_s0  ;;  %78 = vrot.lane.b32.xlu0 %v71_v37, %s314_s1 }
 0x195   :  { %v162_v38 = vpop.permute.xlu1 %161 }
 0x196   :  { %v163_v39 = vsel %vm65_vm1, %v162_v38, %v156_v30 }
 0x197   :  { %174 = vrot.lane.b32.xlu1 %v163_v39, %s313_s0  ;;  %166 = vrot.lane.b32.xlu0 %v163_v39, %s314_s1 }
 0x19b   :  { %182 = vrot.lane.b32.xlu1 %v163_v39, %s315_s19  ;;  %101 = vrot.lane.b32.xlu0 %v71_v37, %s315_s19 }
 0x205   :  { %v79_v42 = vpop.permute.xlu0 %78  ;;  %v90_v43 = vpop.permute.xlu1 %89 }
 0x206   :  { %v81_v46 = vsel %vm373_vm4, %v79_v42, 0.0  ;;  %v92_v48 = vsel %vm86_vm5, %v90_v43, 0.0 }
 0x207   :  { %v83_v53 = vmul.f32 %v82_v45, %v81_v46  ;;  %v94_v54 = vmul.f32 %v93_v47, %v92_v48 }
 0x209   :  { %v167_v49 = vpop.permute.xlu0 %166  ;;  %v175_v50 = vpop.permute.xlu1 %174  ;;  %v95_v62 = vadd.f32 %v94_v54, %v83_v53 }
 0x20a   :  { %v169_v51 = vsel %vm373_vm4, %v167_v49, 0.0  ;;  %v177_v52 = vsel %vm86_vm5, %v175_v50, 0.0 }
 0x20b   :  { %v171_v55 = vmul.f32 %v169_v51, %v82_v45  ;;  %v179_v56 = vmul.f32 %v177_v52, %v93_v47 }
 0x20d   :  { %v102_v58 = vpop.permute.xlu0 %101  ;;  %v183_v59 = vpop.permute.xlu1 %182  ;;  %v180_v63 = vadd.f32 %v179_v56, %v171_v55 }
 0x20e   :  { %v104_v60 = vsel %vm98_vm6, %v102_v58, 0.0  ;;  %v185_v61 = vsel %vm98_vm6, %v183_v59, 0.0 }
 0x20f   :  { %v106_v3 = vmul.f32 %v105_v57, %v104_v60  ;;  %v187_v7 = vmul.f32 %v185_v61, %v105_v57 }
 0x211   :  { %v107_v10 = vadd.f32 %v106_v3, %v95_v62  ;;  %v188_v11 = vadd.f32 %v187_v7, %v180_v63 }
 0x213   :  { %v235_v12 = vmul.f32 -1.442695, %v107_v10  ;;  %v238_v13 = vmul.f32 -1.442695, %v188_v11 }
 0x215   :  { %247 = vpow2.f32 %v235_v12 }
 0x216   :  { %249 = vpow2.f32 %v238_v13 }
 0x222   :  { %v248_v15 = vpop.eup %247 }
 0x223   :  { %v250_v16 = vpop.eup %249  ;;  %v111_v17 = vadd.f32 1.0, %v248_v15 }
 0x224   :  { %v192_v18 = vadd.f32 1.0, %v250_v16 }
 0x225   :  { %251 = vrcp.f32 %v111_v17 }
 0x226   :  { %253 = vrcp.f32 %v192_v18 }
 0x232   :  { %v252_v20 = vpop.eup %251 }
 0x233   :  { %v117_v21 = vrot.slane %v252_v20, %v116_v19  ;;  %v254_v22 = vpop.eup %253 }
 0x234   :  { %v198_v23 = vrot.slane %v254_v22, %v116_v19 }
 0x235   :  { %123 = vbcast.lane.b32.xlu1 %v117_v21, 264  ;;  %119 = vbcast.lane.b32.xlu0 %v117_v21, 256 }
 0x239   :  { %204 = vbcast.lane.b32.xlu1 %v198_v23, 264  ;;  %200 = vbcast.lane.b32.xlu0 %v198_v23, 256 }
 0x2a7   :  { %v120_v24 = vpop.permute.xlu0 %119  ;;  %v124_v25 = vpop.permute.xlu1 %123 }
 0x2a8   :  { %v125_v26 = vmul.f32 %v120_v24, %v345_v2  ;;  %v126_v27 = vmul.f32 %v120_v24, %v349_v4  ;;  %v127_v28 = vmul.f32 %v124_v25, %v357_v8  ;;  %v128_v29 = vmul.f32 %v124_v25, %v359_v9 }
 0x2aa   :  { %129 = vst [vmem:[#allocation7] sm:$0xff] %v125_v26  ;;  %130 = vst [vmem:[#allocation7 + $0x8] sm:$0xff] %v126_v27 }
 0x2ab   :  { %131 = vst [vmem:[#allocation7 + $0x10] sm:$0xff] %v127_v28  ;;  %132 = vst [vmem:[#allocation7 + $0x18] sm:$0xff] %v128_v29  ;;  %v201_v14 = vpop.permute.xlu0 %200  ;;  %v205_v30 = vpop.permute.xlu1 %204 }
 0x2ac   :  { %v206_v31 = vmul.f32 %v201_v14, %v341_v0  ;;  %v207_v32 = vmul.f32 %v201_v14, %v343_v1  ;;  %v208_v2 = vmul.f32 %v205_v30, %v351_v5  ;;  %v209_v4 = vmul.f32 %v205_v30, %v353_v6 }
 0x2ae   :  { %211 = vst [vmem:[#allocation7 + $0x20] sm:$0xff] %v206_v31  ;;  %212 = vst [vmem:[#allocation7 + $0x28] sm:$0xff] %v207_v32 }
 0x2af   :  { %213 = vst [vmem:[#allocation7 + $0x30] sm:$0xff] %v208_v2  ;;  %214 = vst [vmem:[#allocation7 + $0x38] sm:$0xff] %v209_v4 }
 0x2b0   :  { %294 = shalt.err (!%p291_p9)
}
 0x2b1   :  { %226 = dma.vmem_to_hbm [thread:$0]  %s221_s24, 1024, %s398_s2, [#allocation4], %s311_s15, %s311_s15, %s312_s16  }
 0x2b2   :  { %307 = dma.done.wait [#allocation4], 1024  }
 0x2b3   :  { %308 = vsyncadd [#allocation4], 4294966272 }
 0x2b4   :  { %230 = vsyncpa [#allocation3], 1 }
 0x2b5   :  { %231 = vsyncpa [#allocation4], 1 }
 0x2b6   :  { %232 = vsyncpa [#allocation5], 1 }

</bundles_post_ra>
